<compile_context>
chip_gen: v7x
topology: tpu7x:2x2x1
jax: 0.10.0
libtpu: 0.0.40
codegen_flags: <defaults>
</compile_context>

<pallas_src>
import functools

import jax
import jax.numpy as jnp
from jax.experimental import pallas as pl
from jax.experimental.pallas import tpu as pltpu


def _round_up(x, m):
    return ((x + m - 1) // m) * m


def _pick_tile_rows(n_rows, n_cols):
    """Largest row tile whose working set fits the per-generation VMEM budget."""
    try:
        vmem_cap = pltpu.get_tpu_info().vmem_capacity_bytes
    except Exception:  # interpret mode / info unavailable
        vmem_cap = 64 * 1024 * 1024  # v7x floor
    # Stay well under default scoped-VMEM limits on all generations.
    budget = min(vmem_cap // 8, 12 * 1024 * 1024)
    # 2 inputs x 2 pipeline buffers + ~4 live full-tile f32 temporaries.
    bytes_per_row = (2 * 2 + 4) * n_cols * 4
    max_rows = max(8, budget // bytes_per_row)
    tr = min(8192, max_rows, _round_up(n_rows, 8))
    return max(8, (tr // 8) * 8)


def _seqkd_kernel(inv_t_ref, pred_ref, ref_ref, out_ref, *,
                  start_idx, n_rows, tile_rows):
    i = pl.program_id(0)
    inv_t = inv_t_ref[0]

    # Upcast once on load; all math in f32.
    pred = pred_ref[...].astype(jnp.float32) * inv_t   # (tile_rows, C)
    refl = ref_ref[...].astype(jnp.float32) * inv_t

    tr, c = pred.shape

    if start_idx > 0:
        # use_blank=False: exclude leading class column(s) without re-slicing
        # the HBM inputs.  Large-negative (finite) logits -> exp underflows to
        # exactly 0, no inf-inf NaNs, zero contribution to every reduction.
        col = jax.lax.broadcasted_iota(jnp.int32, (tr, c), 1)
        neg = jnp.float32(-1e30)
        valid = col >= start_idx
        pred = jnp.where(valid, pred, neg)
        refl = jnp.where(valid, refl, neg)

    # Row-wise, numerically stable log_softmax of the prediction logits.
    pmax = jnp.max(pred, axis=-1, keepdims=True)
    pshift = pred - pmax
    p_lse = jnp.log(jnp.sum(jnp.exp(pshift), axis=-1, keepdims=True))
    log_pred = pshift - p_lse

    # Reference side, reduced KL form:
    #   sum_c softmax(r)*(log_softmax(r) - log_pred)
    #     = (1/rsum) * sum_c rexp*(rshift - log_pred) - log(rsum)
    rmax = jnp.max(refl, axis=-1, keepdims=True)
    rshift = refl - rmax
    rexp = jnp.exp(rshift)
    rsum = jnp.sum(rexp, axis=-1, keepdims=True)
    inner = jnp.sum(rexp * (rshift - log_pred), axis=-1, keepdims=True)
    row_kl = inner * pl.reciprocal(rsum, approx=True) - jnp.log(rsum)  # (tr,1)

    # Mask ragged tail rows of the cdiv grid (their block data is undefined).
    row = jax.lax.broadcasted_iota(jnp.int32, (tr, 1), 0) + i * tile_rows
    row_kl = jnp.where(row < n_rows, row_kl, 0.0)

    partial = jnp.sum(row_kl)

    # Per-tile partial written as a full (8,128) lane/sublane-dense slab:
    # unmasked vst, distinct block per grid step -> the grid axis is "parallel".
    r8 = jax.lax.broadcasted_iota(jnp.int32, (8, 128), 0)
    c128 = jax.lax.broadcasted_iota(jnp.int32, (8, 128), 1)
    out_ref[...] = jnp.where((r8 == 0) & (c128 == 0), partial, jnp.float32(0.0))


def seqkd_loss(prediction_logits, ref_logits, T=1.0, use_blank=True,
               tile_rows=None):
    """Pallas implementation of SeqKD.forward. Returns a scalar float32 loss."""
    start_idx = 0 if use_blank else 1

    B, S, C = prediction_logits.shape
    N = B * S
    pred2d = prediction_logits.reshape(N, C)   # free reshape, no slicing copy
    ref2d = ref_logits.reshape(N, C)

    tr = tile_rows if tile_rows is not None else _pick_tile_rows(N, C)
    tr = max(8, (tr // 8) * 8)
    num_tiles = -(-N // tr)

    kernel = functools.partial(_seqkd_kernel, start_idx=start_idx,
                               n_rows=N, tile_rows=tr)

    inv_t = jnp.full((1,), 1.0 / T, dtype=jnp.float32)   # SMEM scalar operand

    partials = pl.pallas_call(
        kernel,
        out_shape=jax.ShapeDtypeStruct((num_tiles * 8, 128), jnp.float32),
        grid=(num_tiles,),
        in_specs=[
            pl.BlockSpec(memory_space=pltpu.MemorySpace.SMEM),      # 1/T
            pl.BlockSpec((tr, C), lambda i: (i, 0)),                # pred
            pl.BlockSpec((tr, C), lambda i: (i, 0)),                # ref
        ],
        out_specs=pl.BlockSpec((8, 128), lambda i: (i, 0)),
        compiler_params=pltpu.CompilerParams(
            dimension_semantics=("parallel",)),
    )(inv_t, pred2d, ref2d)

    # batchmean over the flattened rows, scaled by T*T (tiny reduction in JAX).
    return jnp.sum(partials) / jnp.float32(N) * jnp.float32(T * T)


def _seqkd_ref(prediction_logits, ref_logits, T=1.0, use_blank=True):
    start_idx = 0 if use_blank else 1
    pred = prediction_logits[:, :, start_idx:] / T
    ref = ref_logits[:, :, start_idx:] / T
    c_eff = ref.shape[2]
    log_pred = jax.nn.log_softmax(pred, axis=-1).reshape(-1, c_eff)
    p_tgt = jax.nn.softmax(ref, axis=-1).reshape(-1, c_eff)
    kl = jnp.sum(p_tgt * (jnp.log(p_tgt) - log_pred)) / log_pred.shape[0]
    return kl * T * T


if __name__ == "__main__":
    key = jax.random.PRNGKey(0)
    k1, k2 = jax.random.split(key)

    B, S, C = 2, 8, 32  # batch, sequence length, classes (incl. blank)
    prediction_logits = jax.random.normal(k1, (B, S, C), dtype=jnp.float32)
    ref_logits = jax.random.normal(k2, (B, S, C), dtype=jnp.float32)

    # use_blank=True path
    T = 2.0
    loss = jax.block_until_ready(
        seqkd_loss(prediction_logits, ref_logits, T=T, use_blank=True))
    ref = _seqkd_ref(prediction_logits, ref_logits, T=T, use_blank=True)
    assert jnp.allclose(loss, ref, atol=2e-3, rtol=2e-3), (loss, ref)

    # use_blank=False path (blank column masked in-kernel, no wrapper slice)
    loss_nb = jax.block_until_ready(
        seqkd_loss(prediction_logits, ref_logits, T=1.0, use_blank=False))
    ref_nb = _seqkd_ref(prediction_logits, ref_logits, T=1.0, use_blank=False)
    assert jnp.allclose(loss_nb, ref_nb, atol=2e-3, rtol=2e-3), (loss_nb, ref_nb)

    # ragged multi-tile grid (N=21 not a multiple of the row tile) -> exercises
    # the cdiv grid, tail-row masking, and per-tile parallel partials.
    B2, S2 = 3, 7
    p2 = jax.random.normal(k1, (B2, S2, C), dtype=jnp.float32)
    r2 = jax.random.normal(k2, (B2, S2, C), dtype=jnp.float32)
    loss_rag = jax.block_until_ready(
        seqkd_loss(p2, r2, T=1.5, use_blank=True, tile_rows=8))
    ref_rag = _seqkd_ref(p2, r2, T=1.5, use_blank=True)
    assert jnp.allclose(loss_rag, ref_rag, atol=2e-3, rtol=2e-3), (loss_rag, ref_rag)

    print("KERNEL_OK")
</pallas_src>

<mosaic_0001>
module attributes {stable_mosaic.version = 11 : i64} {
  func.func @_seqkd_kernel(%arg0: i32, %arg1: memref<1xf32, #tpu.memory_space<smem>>, %arg2: memref<16x32xf32, #tpu.memory_space<vmem>>, %arg3: memref<16x32xf32, #tpu.memory_space<vmem>>, %arg4: memref<8x128xf32, #tpu.memory_space<vmem>>) attributes {dimension_semantics = [#tpu.dimension_semantics<parallel>], iteration_bounds = array<i64: 1>, scalar_prefetch = 0 : i64, scratch_operands = 0 : i64, tpu.core_type = #tpu.core_type<tc>, window_params = [{transform_indices = @transform_0, window_bounds = array<i64: 1>}, {transform_indices = @transform_1, window_bounds = array<i64: 16, 32>}, {transform_indices = @transform_2, window_bounds = array<i64: 16, 32>}, {transform_indices = @transform_3, window_bounds = array<i64: 8, 128>}]} {
    %c0 = arith.constant 0 : index
    %0 = memref.load %arg1[%c0] : memref<1xf32, #tpu.memory_space<smem>>
    %c0_0 = arith.constant 0 : index
    %c0_1 = arith.constant 0 : index
    %1 = vector.load %arg2[%c0_0, %c0_1] : memref<16x32xf32, #tpu.memory_space<vmem>>, vector<16x32xf32>
    %2 = vector.broadcast %0 : f32 to vector<16x32xf32>
    %3 = arith.mulf %1, %2 : vector<16x32xf32>
    %c0_2 = arith.constant 0 : index
    %c0_3 = arith.constant 0 : index
    %4 = vector.load %arg3[%c0_2, %c0_3] : memref<16x32xf32, #tpu.memory_space<vmem>>, vector<16x32xf32>
    %5 = vector.broadcast %0 : f32 to vector<16x32xf32>
    %6 = arith.mulf %4, %5 : vector<16x32xf32>
    %cst = arith.constant dense<0xFF800000> : vector<16xf32>
    %7 = vector.multi_reduction <maximumf>, %3, %cst [1] : vector<16x32xf32> to vector<16xf32>
    %8 = vector.shape_cast %7 : vector<16xf32> to vector<16x1xf32>
    %9 = vector.broadcast %8 : vector<16x1xf32> to vector<16x32xf32>
    %10 = arith.subf %3, %9 : vector<16x32xf32>
    %11 = math.exp %10 : vector<16x32xf32>
    %cst_4 = arith.constant dense<0.000000e+00> : vector<16xf32>
    %12 = vector.multi_reduction <add>, %11, %cst_4 [1] : vector<16x32xf32> to vector<16xf32>
    %13 = vector.shape_cast %12 : vector<16xf32> to vector<16x1xf32>
    %14 = math.log %13 : vector<16x1xf32>
    %15 = vector.broadcast %14 : vector<16x1xf32> to vector<16x32xf32>
    %16 = arith.subf %10, %15 : vector<16x32xf32>
    %cst_5 = arith.constant dense<0xFF800000> : vector<16xf32>
    %17 = vector.multi_reduction <maximumf>, %6, %cst_5 [1] : vector<16x32xf32> to vector<16xf32>
    %18 = vector.shape_cast %17 : vector<16xf32> to vector<16x1xf32>
    %19 = vector.broadcast %18 : vector<16x1xf32> to vector<16x32xf32>
    %20 = arith.subf %6, %19 : vector<16x32xf32>
    %21 = math.exp %20 : vector<16x32xf32>
    %cst_6 = arith.constant dense<0.000000e+00> : vector<16xf32>
    %22 = vector.multi_reduction <add>, %21, %cst_6 [1] : vector<16x32xf32> to vector<16xf32>
    %23 = vector.shape_cast %22 : vector<16xf32> to vector<16x1xf32>
    %24 = arith.subf %20, %16 : vector<16x32xf32>
    %25 = arith.mulf %21, %24 : vector<16x32xf32>
    %cst_7 = arith.constant dense<0.000000e+00> : vector<16xf32>
    %26 = vector.multi_reduction <add>, %25, %cst_7 [1] : vector<16x32xf32> to vector<16xf32>
    %27 = vector.shape_cast %26 : vector<16xf32> to vector<16x1xf32>
    %28 = tpu.reciprocal %23 {approx = true} : vector<16x1xf32> -> vector<16x1xf32>
    %29 = arith.mulf %27, %28 : vector<16x1xf32>
    %30 = math.log %23 : vector<16x1xf32>
    %31 = arith.subf %29, %30 : vector<16x1xf32>
    %32 = tpu.iota {dimensions = array<i32: 0>} : vector<16x1xi32>
    %c16_i32 = arith.constant 16 : i32
    %33 = arith.muli %arg0, %c16_i32 : i32
    %34 = vector.broadcast %33 : i32 to vector<16x1xi32>
    %35 = arith.addi %32, %34 : vector<16x1xi32>
    %c16_i32_8 = arith.constant 16 : i32
    %36 = vector.broadcast %c16_i32_8 : i32 to vector<16x1xi32>
    %37 = arith.cmpi slt, %35, %36 : vector<16x1xi32>
    %cst_9 = arith.constant 0.000000e+00 : f32
    %38 = vector.broadcast %cst_9 : f32 to vector<16x1xf32>
    %39 = arith.select %37, %31, %38 : vector<16x1xi1>, vector<16x1xf32>
    %40 = vector.shape_cast %39 : vector<16x1xf32> to vector<1x16x1xf32>
    %cst_10 = arith.constant dense<0.000000e+00> : vector<1xf32>
    %41 = vector.multi_reduction <add>, %40, %cst_10 [1, 2] : vector<1x16x1xf32> to vector<1xf32>
    %42 = vector.shape_cast %41 : vector<1xf32> to vector<1x1x1xf32>
    %43 = vector.extract %42[0, 0, 0] : f32 from vector<1x1x1xf32>
    %44 = tpu.iota {dimensions = array<i32: 0>} : vector<8x128xi32>
    %45 = tpu.iota {dimensions = array<i32: 1>} : vector<8x128xi32>
    %c0_i32 = arith.constant 0 : i32
    %46 = vector.broadcast %c0_i32 : i32 to vector<8x128xi32>
    %47 = arith.cmpi eq, %44, %46 : vector<8x128xi32>
    %c0_i32_11 = arith.constant 0 : i32
    %48 = vector.broadcast %c0_i32_11 : i32 to vector<8x128xi32>
    %49 = arith.cmpi eq, %45, %48 : vector<8x128xi32>
    %50 = arith.andi %47, %49 : vector<8x128xi1>
    %cst_12 = arith.constant 0.000000e+00 : f32
    %51 = vector.broadcast %43 : f32 to vector<8x128xf32>
    %52 = vector.broadcast %cst_12 : f32 to vector<8x128xf32>
    %53 = arith.select %50, %51, %52 : vector<8x128xi1>, vector<8x128xf32>
    %c0_13 = arith.constant 0 : index
    %c0_14 = arith.constant 0 : index
    %54 = vector.load %arg4[%c0_13, %c0_14] : memref<8x128xf32, #tpu.memory_space<vmem>>, vector<8x128xf32>
    tpu.vector_store %arg4[%c0_13, %c0_14], %53 {strides = array<i32>} : memref<8x128xf32, #tpu.memory_space<vmem>>, vector<8x128xf32>,
    return
  }
  func.func @transform_0(%arg0: i32) -> i32 {
    %c0_i32 = arith.constant 0 : i32
    %c0_i32_0 = arith.constant 0 : i32
    return %c0_i32 : i32
  }
  func.func @transform_1(%arg0: i32) -> (i32, i32) {
    %c0_i32 = arith.constant 0 : i32
    %c0_i32_0 = arith.constant 0 : i32
    return %arg0, %c0_i32 : i32, i32
  }
  func.func @transform_2(%arg0: i32) -> (i32, i32) {
    %c0_i32 = arith.constant 0 : i32
    %c0_i32_0 = arith.constant 0 : i32
    return %arg0, %c0_i32 : i32, i32
  }
  func.func @transform_3(%arg0: i32) -> (i32, i32) {
    %c0_i32 = arith.constant 0 : i32
    %c0_i32_0 = arith.constant 0 : i32
    return %arg0, %c0_i32 : i32, i32
  }
}

</mosaic_0001>

<bundles_post_ra>
// kernel: tpu_custom_call.1
= control target key start
LH: loop header
LB: loop body
LE: loop exit
PB: predicated region body
PF: predicated region fallthrough
CT: control target
= control target key end

     0   :  { %9 = vsyncpa [#allocation4], 0  ;;  %s338_s0 = inlined_call_operand.<no memory space> [shape: f32[1], index: 0, kind: input, shape index: {}]   ;;  %s339_s1 = inlined_call_operand.hbm [shape: f32[16,32], index: 1, kind: input, shape index: {}]   ;;  %s340_s2 = inlined_call_operand.hbm [shape: f32[16,32], index: 2, kind: input, shape index: {}]   ;;  %s341_s3 = inlined_call_operand.hbm [shape: f32[8,128], index: 3, kind: output, shape index: {}]  }
   0x1   :  { %10 = vsyncpa [#allocation7], 0 }
   0x2   :  { %11 = vsyncpa [#allocation5], 0  ;;  %s264_s12 = smov [#allocation3]   ;;  %s192_s16 = scalar_lea.hbm %s339_s1, 256 }
   0x3   :  { %s19_s13 = sshll.u32 %s264_s12, 4  ;;  %p193_p0 = scmp.ne.s32.totalorder %s339_s1, %s192_s16  ;;  %s20_s13 = int_to_ptr.vmem [resolvable:$true] %s19_s13 }
   0x4   :  { %p196_p1 = scmp.lt.u32.totalorder %s192_s16, %s339_s1 }
   0x6   :  { %p198_p2 = pnand %p196_p1, %p193_p0 }
   0x8   :  { %201 = shalt.err (!%p198_p2)
}
   0x9   :  { %s202_s21 = scalar_lea.vmem %s20_s13, 256  ;;  %p207_p4 = scmp.lt.s32.totalorder %s20_s13, %s20_s13 }
   0xa   :  { %p203_p3 = scmp.ne.s32.totalorder %s20_s13, %s202_s21  ;;  %p208_p5 = scmp.lt.s32.totalorder %s202_s21, %s202_s21 }
   0xc   :  { %p209_p6 = por %p208_p5, %p207_p4 }
   0xe   :  { %p210_p7 = pnand %p209_p6, %p203_p3 }
  0x10   :  { %213 = shalt.err (!%p210_p7)
}
  0x11   :  { %s265_s22 = smov 128   ;;  %s266_s23 = smov 8  }
  0x12   :  { %25 = dma.hbm_to_vmem [thread:$0]  %s339_s1, 256, %s20_s13, [#allocation4], %s265_s22, %s265_s22, %s266_s23  }
  0x13   :  { %s267_s26 = smov [#allocation6]   ;;  %s214_s30 = scalar_lea.hbm %s340_s2, 256 }
  0x14   :  { %s31_s27 = sshll.u32 %s267_s26, 4  ;;  %p215_p8 = scmp.ne.s32.totalorder %s340_s2, %s214_s30  ;;  %s32_s27 = int_to_ptr.vmem [resolvable:$true] %s31_s27 }
  0x15   :  { %p218_p9 = scmp.lt.u32.totalorder %s214_s30, %s340_s2 }
  0x17   :  { %p220_p10 = pnand %p218_p9, %p215_p8 }
  0x19   :  { %223 = shalt.err (!%p220_p10)
}
  0x1a   :  { %s224_s8 = scalar_lea.vmem %s32_s27, 256  ;;  %p229_p12 = scmp.lt.s32.totalorder %s32_s27, %s32_s27 }
  0x1b   :  { %p225_p11 = scmp.ne.s32.totalorder %s32_s27, %s224_s8  ;;  %p230_p13 = scmp.lt.s32.totalorder %s224_s8, %s224_s8 }
  0x1d   :  { %p231_p0 = por %p230_p13, %p229_p12 }
  0x1f   :  { %p232_p1 = pnand %p231_p0, %p225_p11 }
  0x21   :  { %235 = shalt.err (!%p232_p1)
}
  0x22   :  { %37 = dma.hbm_to_vmem [thread:$0]  %s340_s2, 256, %s32_s27, [#allocation7], %s265_s22, %s265_s22, %s266_s23  }
  0x23   :  { %258 = dma.done.wait [#allocation4], 256  }
  0x24   :  { %259 = vsyncadd [#allocation4], 4294967040 }
  0x25   :  { %260 = dma.done.wait [#allocation7], 256  }
  0x26   :  { %261 = vsyncadd [#allocation7], 4294967040  ;;  %v47_v0 = vstv %s338_s0  ;;  %v45_v1 = vld [vmem:[#allocation3] sm:$0xff]  ;;  %vm54_vm0 = vcmask 261120   ;;  %v46_v2 = vld [vmem:[#allocation3 + $0x8] sm:$0xff]  ;;  %vm128_vm1 = vcmask 7168  }
  0x27   :  { %v48_v3 = vmul.f32 %v47_v0, %v45_v1  ;;  %v49_v4 = vmul.f32 %v47_v0, %v46_v2  ;;  %v50_v7 = vld [vmem:[#allocation6] sm:$0xff]  ;;  %v51_v10 = vld [vmem:[#allocation6 + $0x8] sm:$0xff]  ;;  %s268_s0 = smov [#allocation8]  }
  0x28   :  { %v52_v8 = vmul.f32 %v50_v7, %v47_v0  ;;  %v53_v11 = vmul.f32 %v51_v10, %v47_v0  ;;  %v117_v7 = vlaneseq  ;;  %s155_s2 = sshll.u32 %s268_s0, 4  ;;  %s156_s2 = int_to_ptr.vmem [resolvable:$true] %s155_s2 }
  0x29   :  { %v55_v5 = vsel %vm54_vm0, %v48_v3, -inf  ;;  %v58_v6 = vsel %vm54_vm0, %v49_v4, -inf  ;;  %s236_s13 = scalar_lea.vmem %s156_s2, 128  ;;  %p241_p3 = scmp.lt.s32.totalorder %s156_s2, %s156_s2 }
  0x2a   :  { %56 = vmax.xlane.f32.xlu0 %v55_v5  ;;  %v79_v9 = vsel %vm54_vm0, %v52_v8, -inf  ;;  %v82_v12 = vsel %vm54_vm0, %v53_v11, -inf  ;;  %p237_p2 = scmp.ne.s32.totalorder %s156_s2, %s236_s13  ;;  %p242_p4 = scmp.lt.s32.totalorder %s236_s13, %s236_s13 }
  0x2b   :  { %80 = vmax.xlane.f32.xlu1 %v79_v9  ;;  %v142_v9 = vand.u32 127, %v117_v7 }
  0x2c   :  { %p243_p5 = por %p242_p4, %p241_p3 }
  0x2d   :  { %vm144_vm3 = vcmp.eq.s32.totalorder %v142_v9, 0 }
  0x2e   :  { %59 = vmax.xlane.f32.xlu0 %v58_v6  ;;  %p244_p6 = pnand %p243_p5, %p237_p2 }
  0x2f   :  { %83 = vmax.xlane.f32.xlu1 %v82_v12 }
  0xb7   :  { %v57_v13 = vpop.xlane.xlu0 %56 }
  0xb8   :  { %v61_v14 = vsub.f32 %v48_v3, %v57_v13  ;;  %v81_v23 = vpop.xlane.xlu1 %80 }
  0xb9   :  { %v85_v24 = vsub.f32 %v52_v8, %v81_v23  ;;  %v118_v8 = vshrl.u32 %v117_v7, 7 }
  0xba   :  { %v63_v15 = vmul.f32 1.442695, %v61_v14 }
  0xbb   :  { %v60_v16 = vpop.xlane.xlu0 %59  ;;  %v87_v25 = vmul.f32 1.442695, %v85_v24  ;;  %vm143_vm2 = vcmp.eq.s32.totalorder %v118_v8, 0 }
  0xbc   :  { %172 = vpow2.f32 %v63_v15  ;;  %v62_v17 = vsub.f32 %v49_v4, %v60_v16  ;;  %v84_v26 = vpop.xlane.xlu1 %83  ;;  %vm145_vm4 = vmand %vm143_vm2, %vm144_vm3 }
  0xbd   :  { %v86_v27 = vsub.f32 %v53_v11, %v84_v26 }
  0xbe   :  { %v65_v18 = vmul.f32 1.442695, %v62_v17 }
  0xbf   :  { %v89_v28 = vmul.f32 1.442695, %v86_v27 }
  0xc0   :  { %174 = vpow2.f32 %v65_v18 }
  0xc1   :  { %176 = vpow2.f32 %v87_v25 }
  0xc2   :  { %178 = vpow2.f32 %v89_v28 }
  0xc6   :  { %v173_v19 = vpop.eup %172 }
  0xc7   :  { %v67_v20 = vsel %vm54_vm0, %v173_v19, 0.0 }
  0xc8   :  { %68 = vadd.xlane.f32.xlu0 %v67_v20 }
  0xca   :  { %v175_v21 = vpop.eup %174 }
  0xcb   :  { %v70_v22 = vsel %vm54_vm0, %v175_v21, 0.0  ;;  %v177_v29 = vpop.eup %176 }
  0xcc   :  { %71 = vadd.xlane.f32.xlu1 %v70_v22  ;;  %v91_v30 = vsel %vm54_vm0, %v177_v29, 0.0  ;;  %v179_v31 = vpop.eup %178 }
  0xcd   :  { %92 = vadd.xlane.f32.xlu0 %v91_v30  ;;  %v94_v32 = vsel %vm54_vm0, %v179_v31, 0.0 }
  0xd0   :  { %95 = vadd.xlane.f32.xlu1 %v94_v32 }
 0x155   :  { %v69_v33 = vpop.xlane.xlu0 %68 }
 0x156   :  { %180 = vlog2.f32 %v69_v33 }
 0x159   :  { %v72_v34 = vpop.xlane.xlu1 %71 }
 0x15a   :  { %182 = vlog2.f32 %v72_v34  ;;  %v93_v47 = vpop.xlane.xlu0 %92 }
 0x15b   :  { %184 = vrcp.f32 %v93_v47 }
 0x15c   :  { %186 = vlog2.f32 %v93_v47 }
 0x15d   :  { %v96_v48 = vpop.xlane.xlu1 %95 }
 0x15e   :  { %188 = vlog2.f32 %v96_v48 }
 0x15f   :  { %190 = vrcp.f32 %v96_v48 }
 0x160   :  { %v181_v35 = vpop.eup %180 }
 0x161   :  { %v74_v36 = vmul.f32 0.6931472, %v181_v35 }
 0x163   :  { %v77_v37 = vsub.f32 %v61_v14, %v74_v36 }
 0x164   :  { %v183_v38 = vpop.eup %182 }
 0x165   :  { %v76_v39 = vmul.f32 0.6931472, %v183_v38  ;;  %v97_v40 = vsub.f32 %v85_v24, %v77_v37  ;;  %v185_v49 = vpop.eup %184 }
 0x166   :  { %v187_v50 = vpop.eup %186 }
 0x167   :  { %v78_v41 = vsub.f32 %v62_v17, %v76_v39  ;;  %v99_v42 = vmul.f32 %v177_v29, %v97_v40  ;;  %v112_v53 = vmul.f32 0.6931472, %v187_v50 }
 0x168   :  { %v189_v51 = vpop.eup %188 }
 0x169   :  { %v101_v43 = vsel %vm54_vm0, %v99_v42, 0.0  ;;  %v98_v44 = vsub.f32 %v86_v27, %v78_v41  ;;  %v191_v55 = vpop.eup %190  ;;  %v114_v56 = vmul.f32 0.6931472, %v189_v51 }
 0x16a   :  { %102 = vadd.xlane.f32.xlu0 %v101_v43 }
 0x16b   :  { %v100_v45 = vmul.f32 %v179_v31, %v98_v44 }
 0x16d   :  { %v104_v46 = vsel %vm54_vm0, %v100_v45, 0.0 }
 0x16e   :  { %105 = vadd.xlane.f32.xlu1 %v104_v46 }
 0x1f7   :  { %v103_v52 = vpop.xlane.xlu0 %102 }
 0x1f8   :  { %v109_v54 = vmul.f32 %v185_v49, %v103_v52 }
 0x1fa   :  { %v115_v58 = vsub.f32 %v109_v54, %v112_v53 }
 0x1fb   :  { %v106_v57 = vpop.xlane.xlu1 %105 }
 0x1fc   :  { %v110_v59 = vmul.f32 %v191_v55, %v106_v57  ;;  %v129_v61 = vsel %vm128_vm1, %v115_v58, 0.0 }
 0x1fe   :  { %v116_v60 = vsub.f32 %v110_v59, %v114_v56 }
 0x200   :  { %v130_v62 = vsel %vm128_vm1, %v116_v60, 0.0 }
 0x201   :  { %v131_v63 = vadd.f32 %v130_v62, %v129_v61 }
 0x203   :  { %132 = vadd.xlane.f32.xlu0 %v131_v63 }
 0x290   :  { %v133_v0 = vpop.xlane.xlu0 %132 }
 0x291   :  { %v134_v1 = vrot.slane %v133_v0, 4 }
 0x293   :  { %v135_v2 = vadd.f32 %v134_v1, %v133_v0 }
 0x295   :  { %v136_v3 = vrot.slane %v135_v2, 2 }
 0x297   :  { %v137_v4 = vadd.f32 %v136_v3, %v135_v2 }
 0x299   :  { %v138_v5 = vrot.slane %v137_v4, 1 }
 0x29b   :  { %v139_v6 = vadd.f32 %v138_v5, %v137_v4 }
 0x29d   :  { %165 = vpush %v139_v6 }
 0x2ce   :  { %s166_s12 = spop %165 }
 0x2cf   :  { %v146_v10 = vstv %s166_s12 }
 0x2d0   :  { %v147_v11 = vsel %vm145_vm4, %v146_v10, 0.0 }
 0x2d1   :  { %148 = vst [vmem:[#allocation8] sm:$0xff] %v147_v11 }
 0x2d2   :  { %247 = shalt.err (!%p244_p6)
}
 0x2d3   :  { %s248_s16 = scalar_lea.hbm %s341_s3, 128 }
 0x2d4   :  { %p249_p7 = scmp.ne.s32.totalorder %s341_s3, %s248_s16  ;;  %p252_p8 = scmp.lt.u32.totalorder %s248_s16, %s341_s3 }
 0x2d6   :  { %p254_p9 = pnand %p252_p8, %p249_p7 }
 0x2d8   :  { %257 = shalt.err (!%p254_p9)
}
 0x2d9   :  { %158 = dma.vmem_to_hbm [thread:$0]  %s156_s2, 128, %s341_s3, [#allocation5]  }
 0x2da   :  { %262 = dma.done.wait [#allocation5], 128  }
 0x2db   :  { %263 = vsyncadd [#allocation5], 4294967168 }
 0x2dc   :  { %162 = vsyncpa [#allocation4], 1 }
 0x2dd   :  { %163 = vsyncpa [#allocation7], 1 }
 0x2de   :  { %164 = vsyncpa [#allocation5], 1 }

</bundles_post_ra>
